<compile_context>
chip_gen: v7x
topology: tpu7x:2x2x1
jax: 0.10.0
libtpu: 0.0.40
codegen_flags: <defaults>
</compile_context>

<pallas_src>
import functools

import jax
import jax.numpy as jnp
import numpy as np
from jax import lax
from jax.experimental import pallas as pl
from jax.experimental.pallas import tpu as pltpu


def _round_up(a, b):
    return (a + b - 1) // b * b


def _pick_tile(n, k_pad, dim):
    """Pick (tile_n, vmem_limit_bytes) per TPU generation, K-aware."""
    try:
        kind = jax.devices()[0].device_kind.lower()
    except Exception:
        kind = ""
    if "v7" in kind:                      # v7x: 64 MiB physical VMEM per TC
        max_tile, vmem_cap = 1024, 48 * 1024 * 1024
    elif "v5" in kind or "v6" in kind:    # v5e / v6e: 128 MiB VMEM
        max_tile, vmem_cap = 2048, 96 * 1024 * 1024
    else:
        max_tile, vmem_cap = 1024, 32 * 1024 * 1024

    # K-aware cap: the live (TN, Kp) intermediates (score, onehot, one temp)
    # dominate VMEM; the codebook + aux rows are resident exactly once
    # (single-buffered), the x/q tiles are double-buffered by the pipeline.
    resident = k_pad * dim * 4 + 2 * k_pad * 4
    headroom = int(vmem_cap * 0.7) - resident
    per_row = (3 * k_pad + 8 * dim) * 4
    if headroom > per_row * 8:
        k_cap = (headroom // per_row) // 8 * 8
    else:
        k_cap = 8
    tile_n = max(8, min(max_tile, k_cap))

    # Cap by the problem size, and keep >= 2 grid steps when possible so a
    # v7x megacore (2 TensorCores) can split the "parallel" N axis.
    n8 = _round_up(max(n, 8), 8)
    tile_n = min(tile_n, n8)
    if tile_n >= n8 and n8 >= 16:
        tile_n = _round_up((n8 + 1) // 2, 8)
    return tile_n, vmem_cap


def _quantize_kernel(x_ref, w_ref, inv_ref, bias_ref, q_ref, psum_ref, *,
                     n_valid, tile_n):
    """One N-tile of vector quantization.

    x_ref   : (TN, D)  f32  input rows (ragged last tile: tail rows are garbage)
    w_ref   : (Kp, D)  f32  raw codebook, zero rows past n_embed (VMEM-resident)
    inv_ref : (1, Kp)  f32  1/||w_k|| for valid codes, 0 for padded columns
    bias_ref: (1, Kp)  f32  0 for valid codes, -1e30 for padded columns
    q_ref   : (TN, D)       quantized rows out
    psum_ref: (1, 1)   f32  partial sum of squared error for this tile
    """
    x = x_ref[...]
    w = w_ref[...]
    tn, d = x.shape

    # argmin_k ||x - w_k/||w_k|| ||^2 == argmax_k <x, w_k>/||w_k||: ||x||^2 is
    # constant per row and the normalized codes have unit norm, so one MXU
    # matmul + a broadcast scale gives the scores; padded columns get -1e30.
    score = jnp.dot(x, w.T, preferred_element_type=jnp.float32)        # (TN, Kp)
    score = score * inv_ref[...] + bias_ref[...]                       # (TN, Kp)

    # Single K-wide lane reduce (XLU); the one-hot is built from equality with
    # the row max.  NOTE: rows with EXACT float ties between distinct codes
    # (probability ~0 for continuous data) would gather the sum of tied codes
    # instead of the torch first-index tie-break.
    mx = jnp.max(score, axis=1, keepdims=True)                         # (TN, 1)
    onehot = (score == mx).astype(jnp.float32)                         # (TN, Kp)

    # gather: quantize = embedding(argmax) == one-hot @ raw weight (MXU)
    q = jnp.dot(onehot, w, preferred_element_type=jnp.float32)         # (TN, D)

    # Partial SSE for this tile.  Rows past n_valid (ragged last block) may be
    # garbage (NaN/Inf), so mask with where (NaN-safe) and do the per-row
    # reduction on the idle MXU instead of a lane reduce.
    row = lax.broadcasted_iota(jnp.int32, (tn, 1), 0) + pl.program_id(0) * tile_n
    dm = jnp.where(row < n_valid, q - x, 0.0)                          # (TN, D)
    ones_d = jnp.ones((d, 1), jnp.float32)
    row_sq = jnp.dot(dm * dm, ones_d, preferred_element_type=jnp.float32)  # (TN,1)
    psum_ref[...] = jnp.sum(row_sq, axis=0, keepdims=True)             # (1, 1)

    # quantize_1 = input + (quantize - input) == quantize, so the module output
    # (quantize + quantize_1) / 2 == quantize -> return q directly.
    # TODO(synk): for dim < 128, group G=128//dim rows per lane block so the
    # x load / q store are lane-dense (avoids vst.msk partial stores).
    q_ref[...] = q.astype(q_ref.dtype)


def quantize_forward(x, weight):
    """Pallas implementation of Quantize.forward.

    x: (..., dim) float32, channels-last.  weight: (n_embed, dim) float32.
    Returns (out, diff) with out.shape == x.shape, diff scalar.
    """
    orig_shape = x.shape
    n_embed, dim = weight.shape
    flat = x.reshape(-1, dim).astype(jnp.float32)
    n = flat.shape[0]

    k_pad = _round_up(n_embed, 128)          # fill lanes on all K-shaped ops
    tile_n, vmem_cap = _pick_tile(n, k_pad, dim)
    n_tiles = pl.cdiv(n, tile_n)

    # Hoisted out of the per-tile hot path: a single raw codebook copy plus two
    # tiny (1, Kp) rows -- inverse norms and an additive padding bias -- so the
    # kernel does not need a second (normalized) codebook nor any K-wide
    # iota/compare/select masking.
    w32 = weight.astype(jnp.float32)
    w_p = jnp.zeros((k_pad, dim), jnp.float32).at[:n_embed].set(w32)
    inv = lax.rsqrt(jnp.sum(w32 * w32, axis=1))
    inv_p = jnp.zeros((1, k_pad), jnp.float32).at[0, :n_embed].set(inv)
    bias_p = jnp.full((1, k_pad), -1e30, jnp.float32).at[0, :n_embed].set(0.0)

    kernel = functools.partial(_quantize_kernel, n_valid=n, tile_n=tile_n)

    # TODO(synk): for very large codebooks where the K-aware cap forces tiny
    # tile_n, add an inner "arbitrary" grid axis over K with an online
    # (best_score, best_index) carry in VMEM scratch instead.
    q, psums = pl.pallas_call(
        kernel,
        out_shape=(
            jax.ShapeDtypeStruct((n, dim), x.dtype),
            jax.ShapeDtypeStruct((n_tiles, 1, 1), jnp.float32),
        ),
        grid_spec=pltpu.PrefetchScalarGridSpec(
            num_scalar_prefetch=0,
            grid=(n_tiles,),
            in_specs=[
                pl.BlockSpec((tile_n, dim), lambda i: (i, 0)),
                # Unblocked + VMEM-resident: one copy for the whole grid, no
                # per-step double-buffering of the (constant) codebook.
                pl.BlockSpec(memory_space=pltpu.MemorySpace.VMEM),
                pl.BlockSpec(memory_space=pltpu.MemorySpace.VMEM),
                pl.BlockSpec(memory_space=pltpu.MemorySpace.VMEM),
            ],
            out_specs=(
                pl.BlockSpec((tile_n, dim), lambda i: (i, 0)),
                pl.BlockSpec((None, 1, 1), lambda i: (i, 0, 0)),  # per-tile SSE
            ),
        ),
        compiler_params=pltpu.CompilerParams(
            dimension_semantics=("parallel",),   # N-tiles independent (v7x 2 TCs)
            vmem_limit_bytes=vmem_cap,
        ),
    )(flat, w_p, inv_p, bias_p)

    diff = jnp.sum(psums) / jnp.float32(n * dim)
    return q.reshape(orig_shape), diff


def _reference_forward(x, weight):
    """Pure-JAX reference mirroring the PyTorch forward."""
    dim = weight.shape[1]
    embed = weight.T
    embed = embed / jnp.linalg.norm(embed, axis=0)
    flat = x.reshape(-1, dim)
    dist = (jnp.sum(flat ** 2, axis=1, keepdims=True)
            - 2.0 * flat @ embed
            + jnp.sum(embed ** 2, axis=0, keepdims=True))
    ind = jnp.argmax(-dist, axis=1)
    quantize = weight[ind].reshape(x.shape)
    diff = jnp.mean((quantize - x) ** 2)
    q1 = x + (quantize - x)
    return (quantize + q1) / 2.0, diff


if __name__ == "__main__":
    key = jax.random.PRNGKey(0)
    k_w, k_x = jax.random.split(key)

    dim = 32
    n_embed = 64
    # nn.Embedding default init: N(0, 1)
    weight = jax.random.normal(k_w, (n_embed, dim), dtype=jnp.float32)
    # input: (B, H, W, dim) channels-last
    x = jax.random.normal(k_x, (2, 4, 4, dim), dtype=jnp.float32)

    out, diff = quantize_forward(x, weight)
    out = jax.block_until_ready(out)
    diff = jax.block_until_ready(diff)

    out_ref, diff_ref = _reference_forward(x, weight)
    assert out.shape == x.shape
    assert np.allclose(np.asarray(out), np.asarray(out_ref), atol=1e-5, rtol=1e-5)
    assert np.allclose(float(diff), float(diff_ref), atol=1e-5, rtol=1e-5)

    print("KERNEL_OK")
</pallas_src>

<mosaic_0001>
module attributes {stable_mosaic.version = 11 : i64} {
  func.func @_quantize_kernel(%arg0: i32, %arg1: memref<16x32xf32, #tpu.memory_space<vmem>>, %arg2: memref<128x32xf32, #tpu.memory_space<vmem>>, %arg3: memref<1x128xf32, #tpu.memory_space<vmem>>, %arg4: memref<1x128xf32, #tpu.memory_space<vmem>>, %arg5: memref<16x32xf32, #tpu.memory_space<vmem>>, %arg6: memref<1x1x1xf32, #tpu.memory_space<vmem>>) attributes {dimension_semantics = [#tpu.dimension_semantics<parallel>], iteration_bounds = array<i64: 2>, scalar_prefetch = 0 : i64, scratch_operands = 0 : i64, tpu.core_type = #tpu.core_type<tc>, window_params = [{transform_indices = @transform_0, window_bounds = array<i64: 16, 32>}, {pipeline_mode = #tpu.pipeline_mode<synchronous>, transform_indices = @transform_1, window_bounds = array<i64: 128, 32>}, {pipeline_mode = #tpu.pipeline_mode<synchronous>, transform_indices = @transform_2, window_bounds = array<i64: 1, 128>}, {pipeline_mode = #tpu.pipeline_mode<synchronous>, transform_indices = @transform_3, window_bounds = array<i64: 1, 128>}, {transform_indices = @transform_4, window_bounds = array<i64: 16, 32>}, {transform_indices = @transform_5, window_bounds = array<i64: 1, 1, 1>}]} {
    %c0 = arith.constant 0 : index
    %c0_0 = arith.constant 0 : index
    %0 = vector.load %arg1[%c0, %c0_0] : memref<16x32xf32, #tpu.memory_space<vmem>>, vector<16x32xf32>
    %c0_1 = arith.constant 0 : index
    %c0_2 = arith.constant 0 : index
    %1 = vector.load %arg2[%c0_1, %c0_2] : memref<128x32xf32, #tpu.memory_space<vmem>>, vector<128x32xf32>
    %2 = tpu.transpose %1, [1, 0] : vector<128x32xf32> -> vector<32x128xf32>
    %cst = arith.constant dense<0.000000e+00> : vector<16x128xf32>
    %3 = tpu.matmul %0, %2, %cst {dimension_numbers = #tpu.dot_dimension_numbers<[1], [0], [0], [1], [0, 0, 1, 1], [], []>} : vector<16x32xf32>, vector<32x128xf32>, vector<16x128xf32> -> vector<16x128xf32>
    %c0_3 = arith.constant 0 : index
    %c0_4 = arith.constant 0 : index
    %4 = vector.load %arg3[%c0_3, %c0_4] : memref<1x128xf32, #tpu.memory_space<vmem>>, vector<1x128xf32>
    %5 = vector.broadcast %4 : vector<1x128xf32> to vector<16x128xf32>
    %6 = arith.mulf %3, %5 : vector<16x128xf32>
    %c0_5 = arith.constant 0 : index
    %c0_6 = arith.constant 0 : index
    %7 = vector.load %arg4[%c0_5, %c0_6] : memref<1x128xf32, #tpu.memory_space<vmem>>, vector<1x128xf32>
    %8 = vector.broadcast %7 : vector<1x128xf32> to vector<16x128xf32>
    %9 = arith.addf %6, %8 : vector<16x128xf32>
    %cst_7 = arith.constant dense<0xFF800000> : vector<16xf32>
    %10 = vector.multi_reduction <maximumf>, %9, %cst_7 [1] : vector<16x128xf32> to vector<16xf32>
    %11 = vector.shape_cast %10 : vector<16xf32> to vector<16x1xf32>
    %12 = vector.broadcast %11 : vector<16x1xf32> to vector<16x128xf32>
    %13 = arith.cmpf oeq, %9, %12 : vector<16x128xf32>
    %14 = arith.extui %13 : vector<16x128xi1> to vector<16x128xi32>
    %15 = arith.sitofp %14 : vector<16x128xi32> to vector<16x128xf32>
    %cst_8 = arith.constant dense<0.000000e+00> : vector<16x32xf32>
    %16 = tpu.matmul %15, %1, %cst_8 {dimension_numbers = #tpu.dot_dimension_numbers<[1], [0], [0], [1], [0, 0, 1, 1], [], []>} : vector<16x128xf32>, vector<128x32xf32>, vector<16x32xf32> -> vector<16x32xf32>
    %17 = tpu.iota {dimensions = array<i32: 0>} : vector<16x1xi32>
    %c16_i32 = arith.constant 16 : i32
    %18 = arith.muli %arg0, %c16_i32 : i32
    %19 = vector.broadcast %18 : i32 to vector<16x1xi32>
    %20 = arith.addi %17, %19 : vector<16x1xi32>
    %c32_i32 = arith.constant 32 : i32
    %21 = vector.broadcast %c32_i32 : i32 to vector<16x1xi32>
    %22 = arith.cmpi slt, %20, %21 : vector<16x1xi32>
    %23 = arith.subf %16, %0 : vector<16x32xf32>
    %cst_9 = arith.constant 0.000000e+00 : f32
    %24 = vector.shape_cast %22 : vector<16x1xi1> to vector<16x1xi1>
    %25 = vector.broadcast %24 : vector<16x1xi1> to vector<16x32xi1>
    %26 = vector.broadcast %cst_9 : f32 to vector<16x32xf32>
    %27 = arith.select %25, %23, %26 : vector<16x32xi1>, vector<16x32xf32>
    %cst_10 = arith.constant 1.000000e+00 : f32
    %28 = vector.broadcast %cst_10 : f32 to vector<32x1xf32>
    %29 = arith.mulf %27, %27 : vector<16x32xf32>
    %cst_11 = arith.constant dense<0.000000e+00> : vector<16x1xf32>
    %30 = tpu.matmul %29, %28, %cst_11 {dimension_numbers = #tpu.dot_dimension_numbers<[1], [0], [0], [1], [0, 0, 1, 1], [], []>} : vector<16x32xf32>, vector<32x1xf32>, vector<16x1xf32> -> vector<16x1xf32>
    %cst_12 = arith.constant dense<0.000000e+00> : vector<1xf32>
    %31 = vector.multi_reduction <add>, %30, %cst_12 [0] : vector<16x1xf32> to vector<1xf32>
    %32 = vector.shape_cast %31 : vector<1xf32> to vector<1x1xf32>
    %c0_13 = arith.constant 0 : index
    %c0_14 = arith.constant 0 : index
    %c0_15 = arith.constant 0 : index
    %33 = vector.load %arg6[%c0_13, %c0_14, %c0_15] : memref<1x1x1xf32, #tpu.memory_space<vmem>>, vector<1x1x1xf32>
    %34 = vector.shape_cast %33 : vector<1x1x1xf32> to vector<1x1xf32>
    %35 = vector.shape_cast %32 : vector<1x1xf32> to vector<1x1x1xf32>
    tpu.vector_store %arg6[%c0_13, %c0_14, %c0_15], %35 {strides = array<i32>} : memref<1x1x1xf32, #tpu.memory_space<vmem>>, vector<1x1x1xf32>,
    %c0_16 = arith.constant 0 : index
    %c0_17 = arith.constant 0 : index
    %36 = vector.load %arg5[%c0_16, %c0_17] : memref<16x32xf32, #tpu.memory_space<vmem>>, vector<16x32xf32>
    tpu.vector_store %arg5[%c0_16, %c0_17], %16 {strides = array<i32>} : memref<16x32xf32, #tpu.memory_space<vmem>>, vector<16x32xf32>,
    return
  }
  func.func @transform_0(%arg0: i32) -> (i32, i32) {
    %c0_i32 = arith.constant 0 : i32
    %c0_i32_0 = arith.constant 0 : i32
    return %arg0, %c0_i32 : i32, i32
  }
  func.func @transform_1(%arg0: i32) -> (i32, i32) {
    %c0_i32 = arith.constant 0 : i32
    %c0_i32_0 = arith.constant 0 : i32
    %c0_i32_1 = arith.constant 0 : i32
    return %c0_i32, %c0_i32_0 : i32, i32
  }
  func.func @transform_2(%arg0: i32) -> (i32, i32) {
    %c0_i32 = arith.constant 0 : i32
    %c0_i32_0 = arith.constant 0 : i32
    %c0_i32_1 = arith.constant 0 : i32
    return %c0_i32, %c0_i32_0 : i32, i32
  }
  func.func @transform_3(%arg0: i32) -> (i32, i32) {
    %c0_i32 = arith.constant 0 : i32
    %c0_i32_0 = arith.constant 0 : i32
    %c0_i32_1 = arith.constant 0 : i32
    return %c0_i32, %c0_i32_0 : i32, i32
  }
  func.func @transform_4(%arg0: i32) -> (i32, i32) {
    %c0_i32 = arith.constant 0 : i32
    %c0_i32_0 = arith.constant 0 : i32
    return %arg0, %c0_i32 : i32, i32
  }
  func.func @transform_5(%arg0: i32) -> (i32, i32, i32) {
    %c0_i32 = arith.constant 0 : i32
    %c0_i32_0 = arith.constant 0 : i32
    %c0_i32_1 = arith.constant 0 : i32
    return %arg0, %c0_i32, %c0_i32_0 : i32, i32, i32
  }
}

</mosaic_0001>

<bundles_post_ra>
// kernel: tpu_custom_call.1
= control target key start
LH: loop header
LB: loop body
LE: loop exit
PB: predicated region body
PF: predicated region fallthrough
CT: control target
= control target key end

     0   :  { %11 = vsyncpa [#allocation3], 0  ;;  %s1304_s0 = inlined_call_operand.vmem [shape: f32[32,32], index: 0, kind: input, shape index: {}]   ;;  %s1305_s1 = inlined_call_operand.vmem [shape: f32[128,32], index: 1, kind: input, shape index: {}]   ;;  %s1306_s2 = inlined_call_operand.vmem [shape: f32[1,128], index: 2, kind: input, shape index: {}]   ;;  %s1307_s3 = inlined_call_operand.vmem [shape: f32[1,128], index: 3, kind: input, shape index: {}]   ;;  %s1308_s4 = inlined_call_operand.hbm [shape: f32[32,32], index: 4, kind: output, shape index: {0}]   ;;  %s1309_s5 = inlined_call_operand.vmem [shape: f32[2,1,1], index: 5, kind: output, shape index: {1}]  }
   0x1   :  { %13 = vsyncpa [#allocation3 + $0x1], 0  ;;  %s1090_s18 = smov 0   ;;  %s1092_s19 = smov 0  }
   0x2   :  { %s1094_s20 = smov 0   ;;  %s1096_s21 = smov 0  }
   0x3 LB: > { %s1111_s22 = sadd.s32 4294967295, %s1053_s21   ;;  %s701_s23 = sadd.s32 4294967294, %s1053_s21   ;;  %s1053_s21 = sphi %s1096_s21, %s1317_s21   ;;  %s1049_s20 = sphi %s1094_s20, %s1316_s20   ;;  %s1045_s19 = sphi %s1092_s19, %s1315_s19   ;;  %s1041_s18 = sphi %s1090_s18, %s1314_s18  }
   0x4   : > { %s1115_s24 = sadd.s32 1, %s1053_s21   ;;  %s115_s25 = sadd.s32 1, %s1049_s20 }
   0x5   : > { %s112_s26 = ssub.s32 %s1053_s21, %s1115_s24  ;;  %p125_p0 = scmp.ne.s32.totalorder %s1049_s20, %s1045_s19 }
   0x6   : > { %p113_p1 = scmp.eq.s32.totalorder %s112_s26, 0  ;;  %p126_p2 = scmp.eq.s32.totalorder %s1111_s22, 1 }
   0x7   : > { %p131_p3 = scmp.ne.s32.totalorder %s1045_s19, %s1041_s18  ;;  %p132_p4 = scmp.eq.s32.totalorder %s701_s23, 1 }
   0x8   : > { %s1126_s27 = scalar_select %p113_p1, %s1049_s20, %s115_s25  }
   0x9   : > { %p1128_p5 = por %p126_p2, %p125_p0  ;;  %p1132_p6 = por %p132_p4, %p131_p3 }
   0xa   : > { %p704_p7 = scmp.ge.s32.totalorder %s1053_s21, 1  ;;  %p194_p8 = scmp.lt.s32.totalorder %s1053_s21, 3 }
   0xc   : > { %p195_p9 = pnand %p704_p7, %p194_p8 }
   0xd   : > { %v237_v0 = vld [vmem:[%s1305_s1] sm:$0xff] (!%p195_p9)  ;;  %v238_v1 = vld [vmem:[%s1305_s1 + $0x8] sm:$0xff] (!%p195_p9)  ;;  %vm253_vm0 = vcmask (!%p195_p9), 261120   ;;  %v239_v2 = vld [vmem:[%s1305_s1 + $0x10] sm:$0xff] (!%p195_p9)  ;;  %s706_s11 = sshll.u32 (!%p195_p9), %s1111_s22, 1  ;;  %v1055_v36 = vmov (!%p195_p9), 1.0   ;;  %v486_v39 = vlaneseq (!%p195_p9) }
   0xe   : > { %198 = sbr.rel (%p195_p9) target bundleno = 892 (0x37c), region = 36  ;;  %v864_v3 = vpack.c.bf16 (!%p195_p9), %v238_v1, %v237_v0  ;;  %vm1150_vm1 = vmpackc.low (!%p195_p9), %vm253_vm0, %vm253_vm0  ;;  %v240_v5 = vld [vmem:[%s1305_s1 + $0x18] sm:$0xff] (!%p195_p9)  ;;  %p226_p10 = scmp.lt.s32.totalorder (!%p195_p9), %s706_s11, 3  ;;  %v241_v7 = vld [vmem:[%s1305_s1 + $0x20] sm:$0xff] (!%p195_p9)  ;;  %v1056_v38 = vmov (!%p195_p9), 1.0|1.0  }
   0xf   : > { %v870_v6 = vpack.c.bf16 (!%p195_p9), %v240_v5, %v239_v2  ;;  %v242_v8 = vld [vmem:[%s1305_s1 + $0x28] sm:$0xff] (!%p195_p9)  ;;  %v243_v11 = vld [vmem:[%s1305_s1 + $0x30] sm:$0xff] (!%p195_p9)  ;;  %v244_v12 = vld [vmem:[%s1305_s1 + $0x38] sm:$0xff] (!%p195_p9)  ;;  %v487_v40 = vshrl.u32 (!%p195_p9), %v486_v39, 7  ;;  %s217_s15 = sand.u32 (!%p195_p9), 1, %s1045_s19   ;;  %s740_s25 = sshll.u32 (!%p195_p9), %s1111_s22, 8 }
  0x10   : > { %866 = vmatprep.subr.msk.bf16.mxu0 (!%p195_p9), %vm1150_vm1, %v864_v3  ;;  %913 = vmatprep.subr.bf16.mxu1 (!%p195_p9), %v864_v3  ;;  %v876_v9 = vpack.c.bf16 (!%p195_p9), %v242_v8, %v241_v7  ;;  %v882_v13 = vpack.c.bf16 (!%p195_p9), %v244_v12, %v243_v11  ;;  %v245_v14 = vld [vmem:[%s1305_s1 + $0x40] sm:$0xff] (!%p195_p9)  ;;  %v246_v15 = vld [vmem:[%s1305_s1 + $0x48] sm:$0xff] (!%p195_p9)  ;;  %v247_v17 = vld [vmem:[%s1305_s1 + $0x50] sm:$0xff] (!%p195_p9)  ;;  %s705_s16 = sshll.u32 (!%p195_p9), %s217_s15, 4  ;;  %s1256_s7 = scalar_lea.hbm (!%p195_p9), %s1308_s4, %s740_s25 }
  0x11   : > { %869 = vmatpush3.bf16.xpose.msk.msra.mxu0 (!%p195_p9), %vm1150_vm1, %v864_v3  ;;  %915 = vmatpush3.bf16.msra.mxu1 (!%p195_p9), %v864_v3  ;;  %v888_v16 = vpack.c.bf16 (!%p195_p9), %v246_v15, %v245_v14  ;;  %v248_v18 = vld [vmem:[%s1305_s1 + $0x58] sm:$0xff] (!%p195_p9)  ;;  %v249_v20 = vld [vmem:[%s1305_s1 + $0x60] sm:$0xff] (!%p195_p9)  ;;  %v250_v21 = vld [vmem:[%s1305_s1 + $0x68] sm:$0xff] (!%p195_p9)  ;;  %v488_v41 = vadd.s32 (!%p195_p9), 8, %v487_v40  ;;  %s219_s17 = scalar_lea.vmem (!%p195_p9), [#allocation2], %s705_s16  ;;  %s1258_s8 = scalar_lea.sflag (!%p195_p9), [#allocation3], %s217_s15 }
  0x12   : > { %872 = vmatprep.subr.msk.bf16.mxu0 (!%p195_p9), %vm1150_vm1, %v870_v6  ;;  %917 = vmatprep.subr.bf16.mxu1 (!%p195_p9), %v870_v6  ;;  %v894_v19 = vpack.c.bf16 (!%p195_p9), %v248_v18, %v247_v17  ;;  %v900_v22 = vpack.c.bf16 (!%p195_p9), %v250_v21, %v249_v20  ;;  %v251_v23 = vld [vmem:[%s1305_s1 + $0x70] sm:$0xff] (!%p195_p9)  ;;  %v252_v24 = vld [vmem:[%s1305_s1 + $0x78] sm:$0xff] (!%p195_p9)  ;;  %v726_v27 = vld [vmem:[%s1306_s2] ss:$0 sm:$0xff] (!%p195_p9)  ;;  %s1057_s10 = smov (!%p195_p9), [#allocation2]  }
  0x13   : > { %v906_v25 = vpack.c.bf16 (!%p195_p9), %v252_v24, %v251_v23  ;;  %v727_v30 = vld [vmem:[%s1307_s3] ss:$0 sm:$0xff] (!%p195_p9) }
  0x15   : > { %s1319_s11 = smov (!%p226_p10, %s706_s11), 3  ;;  %919 = vmatpush3.bf16.msra.mxu1 %v870_v6 }
  0x16   : > { %s707_s23 = sshll.u32 %s1319_s11, 3  ;;  %921 = vmatprep.subr.bf16.mxu1 %v876_v9  ;;  %s995_s11 = sshll.u32 %s1057_s10, 4  ;;  %s996_s11 = int_to_ptr.vmem [resolvable:$false] %s995_s11 }
  0x17   : > { %s1172_s30 = scalar_lea.vmem %s1304_s0, %s707_s23  ;;  %s617_s23 = sshll.u32 %s219_s17, 4  ;;  %s1250_s23 = int_to_ptr.vmem [resolvable:$true] %s617_s23 }
  0x18   : > { %v1175_v10 = vld [vmem:[%s1172_s30] sm:$0xff]  ;;  %v236_v26 = vld [vmem:[%s1172_s30 + $0x8] sm:$0xff]  ;;  %s732_s30 = sshll.u32 %s1111_s22, 4  ;;  %s991_s9 = scalar_lea.vmem %s1250_s23, 256 }
  0x19   : > { %815 = vmatprep.mubr.msk.f32.mxu0 %vm253_vm0, %v1175_v10  ;;  %875 = vmatpush3.bf16.xpose.msk.msra.mxu0 %vm1150_vm1, %v870_v6  ;;  %v490_v42 = vstv %s732_s30  ;;  %p992_p11 = scmp.ne.s32.totalorder %s1250_s23, %s991_s9  ;;  %s997_s12 = scalar_lea.vmem %s996_s11, 512 }
  0x1a   : > { %923 = vmatpush3.bf16.msra.mxu1 %v876_v9  ;;  %878 = vmatprep.subr.msk.bf16.mxu0 %vm1150_vm1, %v876_v9  ;;  %v492_v43 = vadd.s32 %v490_v42, %v488_v41  ;;  %v491_v44 = vadd.s32 %v490_v42, %v487_v40  ;;  %p998_p0 = scmp.lt.s32.totalorder %s1250_s23, %s996_s11  ;;  %p999_p1 = scmp.lt.s32.totalorder %s997_s12, %s991_s9 }
  0x1b   : > { %925 = vmatprep.subr.bf16.mxu1 %v882_v13  ;;  %p993_p12 = pnand %p992_p11, %p1128_p5 }
  0x1c   : > { %vm494_vm4 = vcmp.lt.s32.totalorder %v492_v43, 32  ;;  %vm493_vm5 = vcmp.lt.s32.totalorder %v491_v44, 32  ;;  %p1000_p2 = por %p999_p1, %p998_p0 }
  0x1d   : > { %p994_p13 = pneg %p993_p12 }
  0x1e   : > { %927 = vmatpush3.bf16.msra.mxu1 %v882_v13 }
  0x1f   : > { %929 = vmatprep.subr.bf16.mxu1 %v888_v16  ;;  %p1001_p3 = pnand %p1000_p2, %p994_p13 }
  0x21   : > { %881 = vmatpush3.bf16.xpose.msk.msra.mxu0 %vm1150_vm1, %v876_v9 }
  0x22   : > { %931 = vmatpush3.bf16.msra.mxu1 %v888_v16  ;;  %884 = vmatprep.subr.msk.bf16.mxu0 %vm1150_vm1, %v882_v13 }
  0x23   : > { %933 = vmatprep.subr.bf16.mxu1 %v894_v19 }
  0x26   : > { %935 = vmatpush3.bf16.msra.mxu1 %v894_v19 }
  0x27   : > { %937 = vmatprep.subr.bf16.mxu1 %v900_v22 }
  0x29   : > { %887 = vmatpush3.bf16.xpose.msk.msra.mxu0 %vm1150_vm1, %v882_v13 }
  0x2a   : > { %939 = vmatpush3.bf16.msra.mxu1 %v900_v22  ;;  %890 = vmatprep.subr.msk.bf16.mxu0 %vm1150_vm1, %v888_v16 }
  0x2b   : > { %941 = vmatprep.subr.bf16.mxu1 %v906_v25 }
  0x2e   : > { %943 = vmatpush3.bf16.msra.mxu1 %v906_v25 }
  0x2f   : > { %944 = vmatprep.subr.bf16.mxu1 %v1056_v38 }
  0x31   : > { %893 = vmatpush3.bf16.xpose.msk.msra.mxu0 %vm1150_vm1, %v888_v16 }
  0x32   : > { %896 = vmatprep.subr.msk.bf16.mxu0 %vm1150_vm1, %v894_v19 }
  0x39   : > { %899 = vmatpush3.bf16.xpose.msk.msra.mxu0 %vm1150_vm1, %v894_v19 }
  0x3a   : > { %902 = vmatprep.subr.msk.bf16.mxu0 %vm1150_vm1, %v900_v22 }
  0x41   : > { %905 = vmatpush3.bf16.xpose.msk.msra.mxu0 %vm1150_vm1, %v900_v22 }
  0x42   : > { %908 = vmatprep.subr.msk.bf16.mxu0 %vm1150_vm1, %v906_v25 }
  0x49   : > { %911 = vmatpush3.bf16.xpose.msk.msra.mxu0 %vm1150_vm1, %v906_v25 }
  0x50   : > { %816 = vmatmul.mubr.msk.f32.vlgmr.msra.gmra.mrb[0].mxu0 %vm253_vm0, %v236_v26 }
 0x123   : > { %v817_v28 = vpop.f32.mrb[0].mxu0 }
 0x124   : > { %v374_v29 = vpop.f32.mrb[1].mxu0  ;;  %v391_v32 = vmul.f32 %v817_v28, %v726_v27 }
 0x125   : > { %v390_v31 = vmul.f32 %v726_v27, %v374_v29 }
 0x126   : > { %v400_v34 = vadd.f32 %v727_v30, %v391_v32 }
 0x127   : > { %v399_v33 = vadd.f32 %v727_v30, %v390_v31 }
 0x129   : > { %401 = vmax.xlane.f32.xlu0 %v399_v33 }
 0x12d   : > { %403 = vmax.xlane.f32.xlu0 %v400_v34 }
 0x1b6   : > { %v402_v35 = vpop.xlane.xlu0 %401 }
 0x1b7   : > { %vm405_vm2 = vcmp.eq.f32.partialorder %v399_v33, %v402_v35 }
 0x1b8   : > { %850 = vmatprep.mubr.msk.f32.mxu1 %vm405_vm2, %v1055_v36 }
 0x1ba   : > { %v404_v37 = vpop.xlane.xlu0 %403 }
 0x1bb   : > { %vm406_vm3 = vcmp.eq.f32.partialorder %v400_v34, %v404_v37 }
 0x1bc   : > { %851 = vmatmul.mubr.msk.f32.vlgmr.msra.gmra.mrb[0].mxu1 %vm406_vm3, %v1055_v36 }
 0x1bd   : > { %945 = vmatpush3.bf16.msra.mxu1 %v1056_v38 }
 0x1be   : > { %946 = vmatprep.subr.bf16.mxu1 %v1056_v38 }
 0x1c1   : > { %947 = vmatpush3.bf16.msra.mxu1 %v1056_v38 }
 0x28f   : > { %v852_v45 = vpop.f32.mrb[0].mxu1 }
 0x290   : > { %v496_v46 = vsub.f32 %v852_v45, %v236_v26  ;;  %599 = vst.msk [vmem:[%s219_s17 + $0x8] sm:$0xff] %vm253_vm0, %v852_v45  ;;  %v477_v47 = vpop.f32.mrb[1].mxu1 }
 0x291   : > { %v495_v48 = vsub.f32 %v477_v47, %v1175_v10  ;;  %598 = vst.msk [vmem:[%s219_s17] sm:$0xff] %vm253_vm0, %v477_v47 }
 0x292   : > { %v502_v49 = vsel %vm494_vm4, %v496_v46, 0.0 }
 0x293   : > { %v501_v50 = vsel %vm493_vm5, %v495_v48, 0.0  ;;  %v504_v52 = vmul.f32 %v502_v49, %v502_v49 }
 0x294   : > { %v503_v51 = vmul.f32 %v501_v50, %v501_v50 }
 0x296   : > { %861 = vmatprep.mubr.msk.f32.mxu1 %vm253_vm0, %v503_v51 }
 0x297   : > { %862 = vmatmul.mubr.msk.f32.vlgmr.msra.gmra.mrb[2].mxu1 %vm253_vm0, %v504_v52 }
 0x298   : > { %1004 = shalt.err (!%p1001_p3)
}
 0x299   : > { %s1005_s13 = scalar_lea.hbm %s1256_s7, 256  ;;  %s1009_s15 = scalar_lea.hbm %s1308_s4, 512 }
 0x29a   : > { %p1006_p4 = scmp.ne.s32.totalorder %s1256_s7, %s1005_s13  ;;  %p1010_p9 = scmp.lt.u32.totalorder %s1256_s7, %s1308_s4 }
 0x29b   : > { %p1011_p10 = scmp.lt.u32.totalorder %s1009_s15, %s1005_s13  ;;  %p1013_p12 = scmp.lt.u32.totalorder %s1005_s13, %s1256_s7 }
 0x29c   : > { %p1007_p7 = pnand %p1006_p4, %p1128_p5 }
 0x29d   : > { %p1012_p11 = por %p1011_p10, %p1010_p9 }
 0x29e   : > { %p1008_p8 = pneg %p1007_p7 }
 0x29f   : > { %p1014_p13 = por %p1013_p12, %p1012_p11 }
 0x2a1   : > { %p1015_p0 = pnand %p1014_p13, %p1008_p8 }
 0x2a3   : > { %1018 = shalt.err (!%p1015_p0)
}
 0x2a4   : > { %s1058_s25 = smov 128   ;;  %s1059_s26 = smov 8   ;;  %vm586_vm6 = vcmask 7168   ;;  %vm596_vm7 = vcmask 0  }
 0x2a5   : > { %948 = dma.vmem_to_hbm [thread:$0]  (%p1128_p5), %s1250_s23, 256, %s1256_s7, %s1258_s8, %s1058_s25, %s1058_s25, %s1059_s26  }
 0x2a6   : > { %p232_p1 = scmp.lt.s32.totalorder %s1111_s22, 1 }
 0x2a8   : > { %s1321_s22 = smov (!%p232_p1, %s1111_s22), 1 }
 0x2a9   : > { %s234_s10 = scalar_lea.vmem %s1309_s5, %s1321_s22 }
 0x36a   : > { %v863_v53 = vpop.f32.mrb[2].mxu1 }
 0x36b   : > { %v588_v54 = vsel %vm586_vm6, %v863_v53, 0.0  ;;  %v577_v55 = vpop.f32.mrb[3].mxu1 }
 0x36c   : > { %v587_v56 = vsel %vm586_vm6, %v577_v55, 0.0 }
 0x36d   : > { %v589_v57 = vadd.f32 %v588_v54, %v587_v56 }
 0x36f   : > { %v590_v58 = vrot.slane %v589_v57, 4 }
 0x371   : > { %v591_v59 = vadd.f32 %v590_v58, %v589_v57 }
 0x373   : > { %v592_v60 = vrot.slane %v591_v59, 2 }
 0x375   : > { %v593_v61 = vadd.f32 %v592_v60, %v591_v59 }
 0x377   : > { %v594_v62 = vrot.slane %v593_v61, 1 }
 0x379   : > { %v595_v63 = vadd.f32 %v594_v62, %v593_v61 }
 0x37b   : > { %597 = vst.msk [vmem:[%s234_s10] sm:$0x1] %vm596_vm7, %v595_v63 }
 0x37c PF: > { %p954_p5 = scmp.ge.s32.totalorder %s1053_s21, 2  ;;  %s635_s28 = sand.u32 1, %s1041_s18  }
 0x37d   : > { %s636_s23 = scalar_lea.sflag [#allocation3], %s635_s28 }
 0x37e   : > { %p951_p2 = pnand %p954_p5, %p1132_p6 }
 0x380   : > { %1036 = dma.done.wait (!%p951_p2), %s636_s23, 256  }
 0x381   : > { %1038 = vsyncadd (!%p951_p2), %s636_s23, 4294967040  ;;  %p16_p3 = scmp.ge.s32.totalorder %s1115_s24, 4   ;;  %s1314_s18 = smov %s1045_s19 }
 0x382   : > { %s1315_s19 = smov %s1049_s20  ;;  %s1316_s20 = smov %s1126_s27 }
 0x383   : > { %s1317_s21 = smov %s1115_s24  ;;  %18 = sbr.rel (!%p16_p3) target bundleno = 3 (0x3), region = 83 }
 0x38a   :  { %647 = vsyncpa [#allocation3], 1 }
 0x38b   :  { %649 = vsyncpa [#allocation3 + $0x1], 1 }

</bundles_post_ra>
